<compile_context>
chip_gen: v7x
topology: tpu7x:2x2x1
jax: 0.10.0
libtpu: 0.0.40
codegen_flags: <defaults>
</compile_context>

<pallas_src>
import jax
import jax.numpy as jnp
from jax.experimental import pallas as pl
from jax.experimental.pallas import tpu as pltpu

_MIB = 1024 * 1024


def _round_up(x, m):
    return ((x + m - 1) // m) * m


def _linear_kernel(x_ref, w_ref, b_ref, o_ref):
    # x_ref: [TB, D]   (features on the lane axis)
    # w_ref: [1, D]    (lane-dense weight row, resident across the grid)
    # b_ref: (1,)      (scalar bias in SMEM)
    # o_ref: [TB, 1]
    x = x_ref[...].astype(jnp.float32)
    w = w_ref[...].astype(jnp.float32)
    # VPU multiply + cross-lane reduction with f32 accumulate; both stay
    # hidden under the x DMA stream (the kernel is HBM-bound).
    acc = jnp.sum(x * w, axis=-1, keepdims=True)          # [TB, 1] f32
    o_ref[...] = (acc + b_ref[0]).astype(o_ref.dtype)


def _vmem_limit_bytes():
    """Per-generation VMEM limit: ~48 MiB on v7x (64 MiB/TC), ~96 MiB on
    v5e/v6e (128 MiB/TC). Conservative fallback if the query is unavailable."""
    try:
        cap = int(pltpu.get_tpu_info().vmem_capacity_bytes)
    except Exception:  # e.g. interpret mode / older runtimes
        cap = 64 * _MIB
    return max(32 * _MIB, min((3 * cap) // 4, cap - 16 * _MIB))


def _pick_batch_tile(batch, input_dim, x_itemsize, out_itemsize, vmem_limit):
    """Bytes-targeted batch tile for the HBM-bound GEMV.

    Targets ~16 MiB per x buffer, bounded by the real double-buffered VMEM
    footprint (lane-padded D, 128-lane-padded (tb, 1) output buffers, and the
    resident double-buffered weight row)."""
    d_pad = _round_up(input_dim, 128)                       # lane padding
    per_row = 2 * d_pad * x_itemsize + 2 * 128 * out_itemsize
    weight_bytes = 2 * 8 * d_pad * 4                        # [1,D] -> (8, d_pad) f32, x2 buffers
    budget = vmem_limit - 4 * _MIB - weight_bytes           # headroom for internal scratch
    tb_budget = max(8, budget // per_row)
    tb_target = max(8, (16 * _MIB) // (d_pad * x_itemsize))
    tb = min(batch, tb_budget, tb_target)
    tb = max(8, (tb // 8) * 8)                              # keep sublane dim a multiple of 8
    if tb >= batch:
        tb = batch                                          # block == full dim is always legal
    return tb


def _split_for_megacore(batch, input_dim, x_itemsize, tb):
    """If one tile would cover the whole batch but the problem is big enough,
    split into >=2 'parallel' tiles so both v7x TensorCores (sharing the
    3.2 TB/s HBM) stay busy. On 1-TC chips the extra grid step (~0.35 us) is
    negligible above the 4 MiB threshold."""
    d_pad = _round_up(input_dim, 128)
    if tb >= batch and batch >= 16 and batch * d_pad * x_itemsize >= 4 * _MIB:
        tb = min(batch, _round_up(pl.cdiv(batch, 2), 8))
    return tb


def difficulty_predictor(x, weight, bias, *, batch_tile=None):
    """Pallas implementation of DifficultyPredictor.forward.

    Args:
      x:      [batch, input_dim] float32 (or bf16; upcast in-kernel)
      weight: [1, input_dim] float32  (PyTorch nn.Linear weight layout)
      bias:   [1] float32
      batch_tile: optional override of the batch tile (testing / tuning)
    Returns:
      [batch, 1] array with x.dtype
    """
    batch, input_dim = x.shape
    w = weight.reshape(1, input_dim)            # lane-dense [1, D]; no transpose
    b = bias.reshape(1).astype(jnp.float32)     # (1,) scalar for SMEM

    x_itemsize = jnp.dtype(x.dtype).itemsize
    out_dtype = x.dtype
    out_itemsize = jnp.dtype(out_dtype).itemsize

    vmem_limit = _vmem_limit_bytes()
    if batch_tile is None:
        tb = _pick_batch_tile(batch, input_dim, x_itemsize, out_itemsize, vmem_limit)
        tb = _split_for_megacore(batch, input_dim, x_itemsize, tb)
    else:
        tb = max(1, min(batch, batch_tile))
    num_tiles = pl.cdiv(batch, tb)              # last (ragged) tile masked by Pallas

    cost = pl.CostEstimate(
        flops=2 * batch * input_dim,
        transcendentals=0,
        bytes_accessed=batch * input_dim * x_itemsize
        + input_dim * jnp.dtype(weight.dtype).itemsize
        + batch * out_itemsize
        + 4,
    )

    out = pl.pallas_call(
        _linear_kernel,
        out_shape=jax.ShapeDtypeStruct((batch, 1), out_dtype),
        grid=(num_tiles,),
        in_specs=[
            # x: tiled over batch -> pipelined, double-buffered DMA stream.
            pl.BlockSpec((tb, input_dim), lambda i: (i, 0)),
            # weight: constant index_map -> resident in VMEM across the grid.
            pl.BlockSpec((1, input_dim), lambda i: (0, 0)),
            # bias: scalar in SMEM, no padded VMEM tile.
            pl.BlockSpec(memory_space=pltpu.MemorySpace.SMEM),
        ],
        out_specs=pl.BlockSpec((tb, 1), lambda i: (i, 0)),
        compiler_params=pltpu.CompilerParams(
            dimension_semantics=("parallel",),   # independent batch tiles (megacore)
            vmem_limit_bytes=vmem_limit,         # per-generation, from get_tpu_info
        ),
        cost_estimate=cost,
    )(x, w, b)
    return out


def init_params(key, input_dim):
    """Deterministic init mimicking nn.Linear default (U(-1/sqrt(D), 1/sqrt(D)))."""
    kw, kb = jax.random.split(key)
    bound = 1.0 / jnp.sqrt(jnp.float32(input_dim))
    weight = jax.random.uniform(kw, (1, input_dim), jnp.float32, -bound, bound)
    bias = jax.random.uniform(kb, (1,), jnp.float32, -bound, bound)
    return weight, bias


if __name__ == "__main__":
    key = jax.random.PRNGKey(0)
    k_x, k_p, k_x2 = jax.random.split(key, 3)

    # Small demo shape consistent with the module's forward.
    batch, input_dim = 8, 32
    x = jax.random.normal(k_x, (batch, input_dim), jnp.float32)
    weight, bias = init_params(k_p, input_dim)

    out = jax.block_until_ready(difficulty_predictor(x, weight, bias))
    ref = x @ weight.T + bias[None, :]
    assert out.shape == (batch, 1)
    assert jnp.allclose(out, ref, atol=1e-5, rtol=1e-5)

    # Also exercise the multi-tile / ragged-last-tile path with a forced tile.
    b2, d2 = 300, 160
    x2 = jax.random.normal(k_x2, (b2, d2), jnp.float32)
    w2, bias2 = init_params(k_p, d2)
    out2 = jax.block_until_ready(difficulty_predictor(x2, w2, bias2, batch_tile=128))
    ref2 = x2 @ w2.T + bias2[None, :]
    assert out2.shape == (b2, 1)
    assert jnp.allclose(out2, ref2, atol=1e-4, rtol=1e-4)

    print("KERNEL_OK")
</pallas_src>

<mosaic_0001>
module attributes {stable_mosaic.version = 11 : i64} {
  func.func @_linear_kernel(%arg0: i32, %arg1: memref<8x32xf32, #tpu.memory_space<vmem>>, %arg2: memref<1x32xf32, #tpu.memory_space<vmem>>, %arg3: memref<1xf32, #tpu.memory_space<smem>>, %arg4: memref<8x1xf32, #tpu.memory_space<vmem>>) attributes {dimension_semantics = [#tpu.dimension_semantics<parallel>], iteration_bounds = array<i64: 1>, scalar_prefetch = 0 : i64, scratch_operands = 0 : i64, tpu.core_type = #tpu.core_type<tc>, window_params = [{transform_indices = @transform_0, window_bounds = array<i64: 8, 32>}, {pipeline_mode = #tpu.pipeline_mode<synchronous>, transform_indices = @transform_1, window_bounds = array<i64: 1, 32>}, {transform_indices = @transform_2, window_bounds = array<i64: 1>}, {transform_indices = @transform_3, window_bounds = array<i64: 8, 1>}]} {
    %c0 = arith.constant 0 : index
    %c0_0 = arith.constant 0 : index
    %0 = vector.load %arg1[%c0, %c0_0] : memref<8x32xf32, #tpu.memory_space<vmem>>, vector<8x32xf32>
    %c0_1 = arith.constant 0 : index
    %c0_2 = arith.constant 0 : index
    %1 = vector.load %arg2[%c0_1, %c0_2] : memref<1x32xf32, #tpu.memory_space<vmem>>, vector<1x32xf32>
    %2 = vector.broadcast %1 : vector<1x32xf32> to vector<8x32xf32>
    %3 = arith.mulf %0, %2 : vector<8x32xf32>
    %cst = arith.constant dense<0.000000e+00> : vector<8xf32>
    %4 = vector.multi_reduction <add>, %3, %cst [1] : vector<8x32xf32> to vector<8xf32>
    %5 = vector.shape_cast %4 : vector<8xf32> to vector<8x1xf32>
    %c0_3 = arith.constant 0 : index
    %6 = memref.load %arg3[%c0_3] : memref<1xf32, #tpu.memory_space<smem>>
    %7 = vector.broadcast %6 : f32 to vector<8x1xf32>
    %8 = arith.addf %5, %7 : vector<8x1xf32>
    %c0_4 = arith.constant 0 : index
    %c0_5 = arith.constant 0 : index
    %9 = vector.load %arg4[%c0_4, %c0_5] : memref<8x1xf32, #tpu.memory_space<vmem>>, vector<8x1xf32>
    tpu.vector_store %arg4[%c0_4, %c0_5], %8 {strides = array<i32>} : memref<8x1xf32, #tpu.memory_space<vmem>>, vector<8x1xf32>,
    return
  }
  func.func @transform_0(%arg0: i32) -> (i32, i32) {
    %c0_i32 = arith.constant 0 : i32
    %c0_i32_0 = arith.constant 0 : i32
    return %arg0, %c0_i32 : i32, i32
  }
  func.func @transform_1(%arg0: i32) -> (i32, i32) {
    %c0_i32 = arith.constant 0 : i32
    %c0_i32_0 = arith.constant 0 : i32
    %c0_i32_1 = arith.constant 0 : i32
    return %c0_i32, %c0_i32_0 : i32, i32
  }
  func.func @transform_2(%arg0: i32) -> i32 {
    %c0_i32 = arith.constant 0 : i32
    %c0_i32_0 = arith.constant 0 : i32
    return %c0_i32 : i32
  }
  func.func @transform_3(%arg0: i32) -> (i32, i32) {
    %c0_i32 = arith.constant 0 : i32
    %c0_i32_0 = arith.constant 0 : i32
    return %arg0, %c0_i32 : i32, i32
  }
}

</mosaic_0001>

<bundles_post_ra>
// kernel: tpu_custom_call.1
= control target key start
LH: loop header
LB: loop body
LE: loop exit
PB: predicated region body
PF: predicated region fallthrough
CT: control target
= control target key end

     0   :  { %9 = vsyncpa [#allocation4], 0  ;;  %s76_s12 = smov [#allocation3]   ;;  %s118_s0 = inlined_call_operand.hbm [shape: f32[8,32], index: 0, kind: input, shape index: {}]   ;;  %s119_s1 = inlined_call_operand.vmem [shape: f32[1,32], index: 1, kind: input, shape index: {}]   ;;  %s120_s2 = inlined_call_operand.<no memory space> [shape: f32[1], index: 2, kind: input, shape index: {}]   ;;  %s121_s3 = inlined_call_operand.vmem [shape: f32[8,1], index: 3, kind: output, shape index: {}]  }
   0x1   :  { %s16_s13 = sshll.u32 %s76_s12, 4  ;;  %s52_s16 = scalar_lea.hbm %s118_s0, 128  ;;  %s17_s13 = int_to_ptr.vmem [resolvable:$true] %s16_s13 }
   0x2   :  { %p53_p0 = scmp.ne.s32.totalorder %s118_s0, %s52_s16  ;;  %p56_p1 = scmp.lt.u32.totalorder %s52_s16, %s118_s0 }
   0x4   :  { %p58_p2 = pnand %p56_p1, %p53_p0 }
   0x6   :  { %61 = shalt.err (!%p58_p2)
}
   0x7   :  { %s62_s21 = scalar_lea.vmem %s17_s13, 128  ;;  %p67_p4 = scmp.lt.s32.totalorder %s17_s13, %s17_s13 }
   0x8   :  { %p63_p3 = scmp.ne.s32.totalorder %s17_s13, %s62_s21  ;;  %p68_p5 = scmp.lt.s32.totalorder %s62_s21, %s62_s21 }
   0xa   :  { %p69_p6 = por %p68_p5, %p67_p4 }
   0xc   :  { %p70_p7 = pnand %p69_p6, %p63_p3 }
   0xe   :  { %73 = shalt.err (!%p70_p7)
}
   0xf   :  { %19 = dma.hbm_to_vmem [thread:$0]  %s118_s0, 128, %s17_s13, [#allocation4]  }
  0x10   :  { %74 = dma.done.wait [#allocation4], 128  }
  0x11   :  { %75 = vsyncadd [#allocation4], 4294967168  ;;  %v27_v0 = vld [vmem:[#allocation3] sm:$0xff]  ;;  %vm36_vm0 = vcmask 261120   ;;  %v41_v4 = vstv %s120_s2  ;;  %vm43_vm1 = vcmask 7168  }
  0x12   :  { %v50_v1 = vld [vmem:[%s119_s1] ss:$0 sm:$0xff] }
  0x13   :  { %v35_v2 = vmul.f32 %v50_v1, %v27_v0 }
  0x15   :  { %v37_v3 = vsel %vm36_vm0, %v35_v2, 0.0 }
  0x16   :  { %38 = vadd.xlane.f32.xlu0 %v37_v3 }
  0xa3   :  { %v39_v5 = vpop.xlane.xlu0 %38 }
  0xa4   :  { %v42_v6 = vadd.f32 %v41_v4, %v39_v5 }
  0xa6   :  { %44 = vst.msk [vmem:[%s121_s3] sm:$0xff] %vm43_vm1, %v42_v6 }
  0xa7   :  { %49 = vsyncpa [#allocation4], 1 }

</bundles_post_ra>
